<compile_context>
chip_gen: v7x
topology: tpu7x:2x2x1
jax: 0.10.0
libtpu: 0.0.40
codegen_flags: <defaults>
</compile_context>

<pallas_src>
import jax
import jax.numpy as jnp
from jax import lax
from jax.experimental import pallas as pl
from jax.experimental.pallas import tpu as pltpu

# ---- small config consistent with the module ------------------------------------
VOCAB   = 32
EMBED   = 32            # embed_size; == 2*HIDDEN so W_ih of every layer stacks uniformly
HIDDEN  = 16            # hidden_dim
LAYERS  = 2             # num_layers
CLASSES = 4             # class_num
BATCH   = 4
SEQ     = 8
OUT_HIDDEN = 2 * HIDDEN * LAYERS   # bi-rnn: 2 * hidden_dim * num_layers

assert EMBED == 2 * HIDDEN, "weight packing assumes embed_size == 2*hidden_dim"


def _tc_birnn_kernel(ids_ref, emb_ref, wih_ref, whh_ref, b_ref, wout_ref, bout_ref,
                     logits_ref, lin_ref):
    """Single-invocation kernel. ids_ref is time-major flattened: row t*B+b = ids[b, t].

    Packed weights (per layer l):
      wih_ref[l] : (in_dim, 2H)   = [W_ih_fwd | W_ih_rev]           (transposed vs torch)
      whh_ref[l] : (2H, 2H)       = block-diag(W_hh_fwd, W_hh_rev)
      b_ref[l]   : (1, 2H)        = [b_fwd | b_rev]  (b_ih + b_hh folded)
      wout_ref[l]: (2H, CLASSES)  = rows of the Linear head for this layer's final states
    """
    batch = logits_ref.shape[0]
    sb = ids_ref.shape[0]
    seq = sb // batch
    h2 = whh_ref.shape[-1]
    hid = h2 // 2
    num_layers = wih_ref.shape[0]
    vocab = emb_ref.shape[0]

    # lane mask (hoisted): True on the fwd-direction half of the lanes.
    fwd_lane = lax.broadcasted_iota(jnp.int32, (batch, h2), 1) < hid

    # ---- fused embedding lookup: one-hot (SB, V) @ table (V, E) on the MXU --------
    iota_v = lax.broadcasted_iota(jnp.int32, (sb, vocab), 1)
    onehot = (ids_ref[...] == iota_v).astype(jnp.float32)
    layer_in = jnp.dot(onehot, emb_ref[...],
                       preferred_element_type=jnp.float32)        # (SB, EMBED), time-major

    acc = jnp.zeros((batch, logits_ref.shape[-1]), jnp.float32)

    for l in range(num_layers):                     # static unroll over layers
        wih_l  = wih_ref[l]                         # (in, 2H)
        whh_l  = whh_ref[l]                         # (2H, 2H) block-diagonal
        b_l    = b_ref[l]                           # (1, 2H)
        wout_l = wout_ref[l]                        # (2H, C)
        last_layer = (l + 1 == num_layers)

        # Hoisted input projection for BOTH directions: A[t*B+b] = x_t @ [Wf|Wr] + [bf|br]
        a = jnp.dot(layer_in, wih_l, preferred_element_type=jnp.float32) + b_l   # (SB, 2H)

        # Fused bidirectional recurrence: carry h = [h_fwd | h_rev] along lanes.
        # Iteration t advances fwd at time t and rev at time seq-1-t.
        h = jnp.zeros((batch, h2), jnp.float32)
        for t in range(seq):                        # static unroll (SEQ is small & fixed)
            rt = seq - 1 - t
            a_f = a[t * batch:(t + 1) * batch, :]       # fwd uses lanes [0, H)
            a_r = a[rt * batch:(rt + 1) * batch, :]     # rev uses lanes [H, 2H)
            a_t = jnp.where(fwd_lane, a_f, a_r)
            h = jnp.tanh(jnp.dot(h, whh_l, preferred_element_type=jnp.float32) + a_t)
            if not last_layer:
                # Store per-timestep outputs into lane-disjoint halves of the
                # next-layer input (no concatenate at the layer boundary).
                lin_ref[t * batch:(t + 1) * batch, 0:hid] = h[:, 0:hid]
                lin_ref[rt * batch:(rt + 1) * batch, hid:h2] = h[:, hid:h2]

        # End-of-loop carry already holds the FINAL states: [h_fwd(T-1) | h_rev(0)],
        # exactly this layer's slice of h_n.permute(1,0,2).reshape(B,-1).
        acc = acc + jnp.dot(h, wout_l, preferred_element_type=jnp.float32)

        if not last_layer:
            layer_in = lin_ref[...]                  # (SB, 2H) input of next layer

    logits_ref[...] = acc + bout_ref[...]


def _full_spec(shape):
    nd = len(shape)
    return pl.BlockSpec(shape, lambda i, _nd=nd: (0,) * _nd)


def pack_params(params):
    """One-time repacking of torch-style params into the kernel's fused layout."""
    wih, whh, b = params["w_ih"], params["w_hh"], params["b"]
    wout, bout = params["w_out"], params["b_out"]
    L, _, _, H = wih.shape
    wih_cat = jnp.concatenate([wih[:, 0], wih[:, 1]], axis=-1)            # (L, in, 2H)
    b_cat = jnp.concatenate([b[:, 0], b[:, 1]], axis=-1)                  # (L, 1, 2H)
    zero = jnp.zeros((L, H, H), jnp.float32)
    whh_blk = jnp.concatenate(
        [jnp.concatenate([whh[:, 0], zero], axis=-1),
         jnp.concatenate([zero, whh[:, 1]], axis=-1)], axis=-2)           # (L, 2H, 2H)
    wout_l = wout.reshape(L, 2 * H, -1)                                   # (L, 2H, C)
    return {"emb": params["embedding"].astype(jnp.float32),
            "wih": wih_cat.astype(jnp.float32),
            "whh": whh_blk.astype(jnp.float32),
            "b": b_cat.astype(jnp.float32),
            "wout": wout_l.astype(jnp.float32),
            "bout": bout.astype(jnp.float32)}


def tc_forward(input_ids, packed, labels=None):
    # Time-major flatten of the (tiny) int ids; embedding lookup happens in-kernel.
    ids_tm = jnp.transpose(input_ids.astype(jnp.int32)).reshape(SEQ * BATCH, 1)

    logits = pl.pallas_call(
        _tc_birnn_kernel,
        grid=(1,),
        out_shape=jax.ShapeDtypeStruct((BATCH, CLASSES), jnp.float32),
        in_specs=[_full_spec(ids_tm.shape),
                  _full_spec(packed["emb"].shape),
                  _full_spec(packed["wih"].shape),
                  _full_spec(packed["whh"].shape),
                  _full_spec(packed["b"].shape),
                  _full_spec(packed["wout"].shape),
                  _full_spec(packed["bout"].shape)],
        out_specs=_full_spec((BATCH, CLASSES)),
        scratch_shapes=[pltpu.VMEM((SEQ * BATCH, 2 * HIDDEN), jnp.float32)],  # next-layer input
        compiler_params=pltpu.CompilerParams(dimension_semantics=("arbitrary",)),
    )(ids_tm, packed["emb"], packed["wih"], packed["whh"], packed["b"],
      packed["wout"], packed["bout"])

    # TODO(synk): CrossEntropyLoss path not exercised — labels are None here, so loss is None
    loss = None
    return loss, logits, labels


def _reference_logits(input_ids, params):
    """Plain-JAX reference of the same math (on the UNPACKED params) for correctness."""
    emb, wih, whh, b, wout, bout = (params[k] for k in
                                    ("embedding", "w_ih", "w_hh", "b", "w_out", "b_out"))
    x = jnp.take(emb, input_ids, axis=0).astype(jnp.float32)
    layer_in = jnp.transpose(x, (1, 0, 2))
    finals = []
    for l in range(LAYERS):
        h = jnp.zeros((BATCH, HIDDEN), jnp.float32)
        outs_f = []
        for t in range(SEQ):
            h = jnp.tanh(layer_in[t] @ wih[l, 0] + h @ whh[l, 0] + b[l, 0])
            outs_f.append(h)
        h_f = h
        h = jnp.zeros((BATCH, HIDDEN), jnp.float32)
        outs_r = [None] * SEQ
        for i in range(SEQ):
            t = SEQ - 1 - i
            h = jnp.tanh(layer_in[t] @ wih[l, 1] + h @ whh[l, 1] + b[l, 1])
            outs_r[t] = h
        h_r = h
        finals += [h_f, h_r]
        layer_in = jnp.stack([jnp.concatenate([outs_f[t], outs_r[t]], axis=-1)
                              for t in range(SEQ)], axis=0)
    feat = jnp.concatenate(finals, axis=-1)
    return feat @ wout + bout


if __name__ == "__main__":
    key = jax.random.PRNGKey(0)
    ks = jax.random.split(key, 7)
    s_rnn = 1.0 / (HIDDEN ** 0.5)
    s_out = 1.0 / (OUT_HIDDEN ** 0.5)
    params = {
        "embedding": jax.random.normal(ks[0], (VOCAB, EMBED), jnp.float32),
        "w_ih": jax.random.uniform(ks[1], (LAYERS, 2, EMBED, HIDDEN), jnp.float32, -s_rnn, s_rnn),
        "w_hh": jax.random.uniform(ks[2], (LAYERS, 2, HIDDEN, HIDDEN), jnp.float32, -s_rnn, s_rnn),
        # b_ih + b_hh folded into one bias (they are only ever summed)
        "b":    jax.random.uniform(ks[3], (LAYERS, 2, 1, HIDDEN), jnp.float32, -2 * s_rnn, 2 * s_rnn),
        "w_out": jax.random.uniform(ks[4], (OUT_HIDDEN, CLASSES), jnp.float32, -s_out, s_out),
        "b_out": jax.random.uniform(ks[5], (1, CLASSES), jnp.float32, -s_out, s_out),
    }
    input_ids = jax.random.randint(ks[6], (BATCH, SEQ), 0, VOCAB, dtype=jnp.int32)

    packed = pack_params(params)                      # one-time weight repacking
    loss, logits, labels = jax.block_until_ready(tc_forward(input_ids, packed))
    ref = _reference_logits(input_ids, params)
    assert logits.shape == (BATCH, CLASSES)
    assert jnp.allclose(logits, ref, atol=1e-2, rtol=1e-2), (logits, ref)
    print("KERNEL_OK")
</pallas_src>

<mosaic_0001>
module attributes {stable_mosaic.version = 11 : i64} {
  func.func @_tc_birnn_kernel(%arg0: i32, %arg1: memref<32x1xi32, #tpu.memory_space<vmem>>, %arg2: memref<32x32xf32, #tpu.memory_space<vmem>>, %arg3: memref<2x32x32xf32, #tpu.memory_space<vmem>>, %arg4: memref<2x32x32xf32, #tpu.memory_space<vmem>>, %arg5: memref<2x1x32xf32, #tpu.memory_space<vmem>>, %arg6: memref<2x32x4xf32, #tpu.memory_space<vmem>>, %arg7: memref<1x4xf32, #tpu.memory_space<vmem>>, %arg8: memref<4x4xf32, #tpu.memory_space<vmem>>, %arg9: memref<32x32xf32, #tpu.memory_space<vmem>>) attributes {dimension_semantics = [#tpu.dimension_semantics<arbitrary>], iteration_bounds = array<i64: 1>, scalar_prefetch = 0 : i64, scratch_operands = 1 : i64, tpu.core_type = #tpu.core_type<tc>, window_params = [{pipeline_mode = #tpu.pipeline_mode<synchronous>, transform_indices = @transform_0, window_bounds = array<i64: 32, 1>}, {pipeline_mode = #tpu.pipeline_mode<synchronous>, transform_indices = @transform_1, window_bounds = array<i64: 32, 32>}, {pipeline_mode = #tpu.pipeline_mode<synchronous>, transform_indices = @transform_2, window_bounds = array<i64: 2, 32, 32>}, {pipeline_mode = #tpu.pipeline_mode<synchronous>, transform_indices = @transform_3, window_bounds = array<i64: 2, 32, 32>}, {pipeline_mode = #tpu.pipeline_mode<synchronous>, transform_indices = @transform_4, window_bounds = array<i64: 2, 1, 32>}, {pipeline_mode = #tpu.pipeline_mode<synchronous>, transform_indices = @transform_5, window_bounds = array<i64: 2, 32, 4>}, {pipeline_mode = #tpu.pipeline_mode<synchronous>, transform_indices = @transform_6, window_bounds = array<i64: 1, 4>}, {pipeline_mode = #tpu.pipeline_mode<synchronous>, transform_indices = @transform_7, window_bounds = array<i64: 4, 4>}]} {
    %0 = tpu.iota {dimensions = array<i32: 1>} : vector<4x32xi32>
    %c16_i32 = arith.constant 16 : i32
    %1 = vector.broadcast %c16_i32 : i32 to vector<4x32xi32>
    %2 = arith.cmpi slt, %0, %1 : vector<4x32xi32>
    %3 = tpu.iota {dimensions = array<i32: 1>} : vector<32x32xi32>
    %c0 = arith.constant 0 : index
    %c0_0 = arith.constant 0 : index
    %4 = vector.load %arg1[%c0, %c0_0] : memref<32x1xi32, #tpu.memory_space<vmem>>, vector<32x1xi32>
    %5 = vector.broadcast %4 : vector<32x1xi32> to vector<32x32xi32>
    %6 = arith.cmpi eq, %5, %3 : vector<32x32xi32>
    %7 = arith.extui %6 : vector<32x32xi1> to vector<32x32xi32>
    %8 = arith.sitofp %7 : vector<32x32xi32> to vector<32x32xf32>
    %c0_1 = arith.constant 0 : index
    %c0_2 = arith.constant 0 : index
    %9 = vector.load %arg2[%c0_1, %c0_2] : memref<32x32xf32, #tpu.memory_space<vmem>>, vector<32x32xf32>
    %cst = arith.constant dense<0.000000e+00> : vector<32x32xf32>
    %10 = tpu.matmul %8, %9, %cst {dimension_numbers = #tpu.dot_dimension_numbers<[1], [0], [0], [1], [0, 0, 1, 1], [], []>} : vector<32x32xf32>, vector<32x32xf32>, vector<32x32xf32> -> vector<32x32xf32>
    %cst_3 = arith.constant 0.000000e+00 : f32
    %11 = vector.broadcast %cst_3 : f32 to vector<4x4xf32>
    %c0_4 = arith.constant 0 : index
    %c0_5 = arith.constant 0 : index
    %c0_6 = arith.constant 0 : index
    %12 = vector.load %arg3[%c0_4, %c0_5, %c0_6] : memref<2x32x32xf32, #tpu.memory_space<vmem>>, vector<1x32x32xf32>
    %13 = vector.shape_cast %12 : vector<1x32x32xf32> to vector<32x32xf32>
    %c0_7 = arith.constant 0 : index
    %c0_8 = arith.constant 0 : index
    %c0_9 = arith.constant 0 : index
    %14 = vector.load %arg4[%c0_7, %c0_8, %c0_9] : memref<2x32x32xf32, #tpu.memory_space<vmem>>, vector<1x32x32xf32>
    %15 = vector.shape_cast %14 : vector<1x32x32xf32> to vector<32x32xf32>
    %c0_10 = arith.constant 0 : index
    %c0_11 = arith.constant 0 : index
    %c0_12 = arith.constant 0 : index
    %16 = vector.load %arg5[%c0_10, %c0_11, %c0_12] : memref<2x1x32xf32, #tpu.memory_space<vmem>>, vector<1x1x32xf32>
    %17 = vector.shape_cast %16 : vector<1x1x32xf32> to vector<1x32xf32>
    %c0_13 = arith.constant 0 : index
    %c0_14 = arith.constant 0 : index
    %c0_15 = arith.constant 0 : index
    %18 = vector.load %arg6[%c0_13, %c0_14, %c0_15] : memref<2x32x4xf32, #tpu.memory_space<vmem>>, vector<1x32x4xf32>
    %19 = vector.shape_cast %18 : vector<1x32x4xf32> to vector<32x4xf32>
    %cst_16 = arith.constant dense<0.000000e+00> : vector<32x32xf32>
    %20 = tpu.matmul %10, %13, %cst_16 {dimension_numbers = #tpu.dot_dimension_numbers<[1], [0], [0], [1], [0, 0, 1, 1], [], []>} : vector<32x32xf32>, vector<32x32xf32>, vector<32x32xf32> -> vector<32x32xf32>
    %21 = vector.broadcast %17 : vector<1x32xf32> to vector<32x32xf32>
    %22 = arith.addf %20, %21 : vector<32x32xf32>
    %cst_17 = arith.constant 0.000000e+00 : f32
    %23 = vector.broadcast %cst_17 : f32 to vector<4x32xf32>
    %24 = vector.extract_strided_slice %22 {offsets = [0, 0], sizes = [4, 32], strides = [1, 1]} : vector<32x32xf32> to vector<4x32xf32>
    %25 = vector.extract_strided_slice %22 {offsets = [28, 0], sizes = [4, 32], strides = [1, 1]} : vector<32x32xf32> to vector<4x32xf32>
    %26 = arith.select %2, %24, %25 : vector<4x32xi1>, vector<4x32xf32>
    %cst_18 = arith.constant dense<0.000000e+00> : vector<4x32xf32>
    %27 = tpu.matmul %23, %15, %cst_18 {dimension_numbers = #tpu.dot_dimension_numbers<[1], [0], [0], [1], [0, 0, 1, 1], [], []>} : vector<4x32xf32>, vector<32x32xf32>, vector<4x32xf32> -> vector<4x32xf32>
    %28 = arith.addf %27, %26 : vector<4x32xf32>
    %29 = math.tanh %28 : vector<4x32xf32>
    %30 = vector.extract_strided_slice %29 {offsets = [0, 0], sizes = [4, 16], strides = [1, 1]} : vector<4x32xf32> to vector<4x16xf32>
    %c0_19 = arith.constant 0 : index
    %c0_20 = arith.constant 0 : index
    %31 = vector.load %arg9[%c0_19, %c0_20] : memref<32x32xf32, #tpu.memory_space<vmem>>, vector<4x16xf32>
    tpu.vector_store %arg9[%c0_19, %c0_20], %30 {strides = array<i32>} : memref<32x32xf32, #tpu.memory_space<vmem>>, vector<4x16xf32>,
    %32 = vector.extract_strided_slice %29 {offsets = [0, 16], sizes = [4, 16], strides = [1, 1]} : vector<4x32xf32> to vector<4x16xf32>
    %c28 = arith.constant 28 : index
    %c16 = arith.constant 16 : index
    %33 = vector.load %arg9[%c28, %c16] : memref<32x32xf32, #tpu.memory_space<vmem>>, vector<4x16xf32>
    tpu.vector_store %arg9[%c28, %c16], %32 {strides = array<i32>} : memref<32x32xf32, #tpu.memory_space<vmem>>, vector<4x16xf32>,
    %34 = vector.extract_strided_slice %22 {offsets = [4, 0], sizes = [4, 32], strides = [1, 1]} : vector<32x32xf32> to vector<4x32xf32>
    %35 = vector.extract_strided_slice %22 {offsets = [24, 0], sizes = [4, 32], strides = [1, 1]} : vector<32x32xf32> to vector<4x32xf32>
    %36 = arith.select %2, %34, %35 : vector<4x32xi1>, vector<4x32xf32>
    %cst_21 = arith.constant dense<0.000000e+00> : vector<4x32xf32>
    %37 = tpu.matmul %29, %15, %cst_21 {dimension_numbers = #tpu.dot_dimension_numbers<[1], [0], [0], [1], [0, 0, 1, 1], [], []>} : vector<4x32xf32>, vector<32x32xf32>, vector<4x32xf32> -> vector<4x32xf32>
    %38 = arith.addf %37, %36 : vector<4x32xf32>
    %39 = math.tanh %38 : vector<4x32xf32>
    %40 = vector.extract_strided_slice %39 {offsets = [0, 0], sizes = [4, 16], strides = [1, 1]} : vector<4x32xf32> to vector<4x16xf32>
    %c4 = arith.constant 4 : index
    %c0_22 = arith.constant 0 : index
    %41 = vector.load %arg9[%c4, %c0_22] : memref<32x32xf32, #tpu.memory_space<vmem>>, vector<4x16xf32>
    tpu.vector_store %arg9[%c4, %c0_22], %40 {strides = array<i32>} : memref<32x32xf32, #tpu.memory_space<vmem>>, vector<4x16xf32>,
    %42 = vector.extract_strided_slice %39 {offsets = [0, 16], sizes = [4, 16], strides = [1, 1]} : vector<4x32xf32> to vector<4x16xf32>
    %c24 = arith.constant 24 : index
    %c16_23 = arith.constant 16 : index
    %43 = vector.load %arg9[%c24, %c16_23] : memref<32x32xf32, #tpu.memory_space<vmem>>, vector<4x16xf32>
    tpu.vector_store %arg9[%c24, %c16_23], %42 {strides = array<i32>} : memref<32x32xf32, #tpu.memory_space<vmem>>, vector<4x16xf32>,
    %44 = vector.extract_strided_slice %22 {offsets = [8, 0], sizes = [4, 32], strides = [1, 1]} : vector<32x32xf32> to vector<4x32xf32>
    %45 = vector.extract_strided_slice %22 {offsets = [20, 0], sizes = [4, 32], strides = [1, 1]} : vector<32x32xf32> to vector<4x32xf32>
    %46 = arith.select %2, %44, %45 : vector<4x32xi1>, vector<4x32xf32>
    %cst_24 = arith.constant dense<0.000000e+00> : vector<4x32xf32>
    %47 = tpu.matmul %39, %15, %cst_24 {dimension_numbers = #tpu.dot_dimension_numbers<[1], [0], [0], [1], [0, 0, 1, 1], [], []>} : vector<4x32xf32>, vector<32x32xf32>, vector<4x32xf32> -> vector<4x32xf32>
    %48 = arith.addf %47, %46 : vector<4x32xf32>
    %49 = math.tanh %48 : vector<4x32xf32>
    %50 = vector.extract_strided_slice %49 {offsets = [0, 0], sizes = [4, 16], strides = [1, 1]} : vector<4x32xf32> to vector<4x16xf32>
    %c8 = arith.constant 8 : index
    %c0_25 = arith.constant 0 : index
    %51 = vector.load %arg9[%c8, %c0_25] : memref<32x32xf32, #tpu.memory_space<vmem>>, vector<4x16xf32>
    tpu.vector_store %arg9[%c8, %c0_25], %50 {strides = array<i32>} : memref<32x32xf32, #tpu.memory_space<vmem>>, vector<4x16xf32>,
    %52 = vector.extract_strided_slice %49 {offsets = [0, 16], sizes = [4, 16], strides = [1, 1]} : vector<4x32xf32> to vector<4x16xf32>
    %c20 = arith.constant 20 : index
    %c16_26 = arith.constant 16 : index
    %53 = vector.load %arg9[%c20, %c16_26] : memref<32x32xf32, #tpu.memory_space<vmem>>, vector<4x16xf32>
    tpu.vector_store %arg9[%c20, %c16_26], %52 {strides = array<i32>} : memref<32x32xf32, #tpu.memory_space<vmem>>, vector<4x16xf32>,
    %54 = vector.extract_strided_slice %22 {offsets = [12, 0], sizes = [4, 32], strides = [1, 1]} : vector<32x32xf32> to vector<4x32xf32>
    %55 = vector.extract_strided_slice %22 {offsets = [16, 0], sizes = [4, 32], strides = [1, 1]} : vector<32x32xf32> to vector<4x32xf32>
    %56 = arith.select %2, %54, %55 : vector<4x32xi1>, vector<4x32xf32>
    %cst_27 = arith.constant dense<0.000000e+00> : vector<4x32xf32>
    %57 = tpu.matmul %49, %15, %cst_27 {dimension_numbers = #tpu.dot_dimension_numbers<[1], [0], [0], [1], [0, 0, 1, 1], [], []>} : vector<4x32xf32>, vector<32x32xf32>, vector<4x32xf32> -> vector<4x32xf32>
    %58 = arith.addf %57, %56 : vector<4x32xf32>
    %59 = math.tanh %58 : vector<4x32xf32>
    %60 = vector.extract_strided_slice %59 {offsets = [0, 0], sizes = [4, 16], strides = [1, 1]} : vector<4x32xf32> to vector<4x16xf32>
    %c12 = arith.constant 12 : index
    %c0_28 = arith.constant 0 : index
    %61 = vector.load %arg9[%c12, %c0_28] : memref<32x32xf32, #tpu.memory_space<vmem>>, vector<4x16xf32>
    tpu.vector_store %arg9[%c12, %c0_28], %60 {strides = array<i32>} : memref<32x32xf32, #tpu.memory_space<vmem>>, vector<4x16xf32>,
    %62 = vector.extract_strided_slice %59 {offsets = [0, 16], sizes = [4, 16], strides = [1, 1]} : vector<4x32xf32> to vector<4x16xf32>
    %c16_29 = arith.constant 16 : index
    %c16_30 = arith.constant 16 : index
    %63 = vector.load %arg9[%c16_29, %c16_30] : memref<32x32xf32, #tpu.memory_space<vmem>>, vector<4x16xf32>
    tpu.vector_store %arg9[%c16_29, %c16_30], %62 {strides = array<i32>} : memref<32x32xf32, #tpu.memory_space<vmem>>, vector<4x16xf32>,
    %64 = vector.extract_strided_slice %22 {offsets = [16, 0], sizes = [4, 32], strides = [1, 1]} : vector<32x32xf32> to vector<4x32xf32>
    %65 = vector.extract_strided_slice %22 {offsets = [12, 0], sizes = [4, 32], strides = [1, 1]} : vector<32x32xf32> to vector<4x32xf32>
    %66 = arith.select %2, %64, %65 : vector<4x32xi1>, vector<4x32xf32>
    %cst_31 = arith.constant dense<0.000000e+00> : vector<4x32xf32>
    %67 = tpu.matmul %59, %15, %cst_31 {dimension_numbers = #tpu.dot_dimension_numbers<[1], [0], [0], [1], [0, 0, 1, 1], [], []>} : vector<4x32xf32>, vector<32x32xf32>, vector<4x32xf32> -> vector<4x32xf32>
    %68 = arith.addf %67, %66 : vector<4x32xf32>
    %69 = math.tanh %68 : vector<4x32xf32>
    %70 = vector.extract_strided_slice %69 {offsets = [0, 0], sizes = [4, 16], strides = [1, 1]} : vector<4x32xf32> to vector<4x16xf32>
    %c16_32 = arith.constant 16 : index
    %c0_33 = arith.constant 0 : index
    %71 = vector.load %arg9[%c16_32, %c0_33] : memref<32x32xf32, #tpu.memory_space<vmem>>, vector<4x16xf32>
    tpu.vector_store %arg9[%c16_32, %c0_33], %70 {strides = array<i32>} : memref<32x32xf32, #tpu.memory_space<vmem>>, vector<4x16xf32>,
    %72 = vector.extract_strided_slice %69 {offsets = [0, 16], sizes = [4, 16], strides = [1, 1]} : vector<4x32xf32> to vector<4x16xf32>
    %c12_34 = arith.constant 12 : index
    %c16_35 = arith.constant 16 : index
    %73 = vector.load %arg9[%c12_34, %c16_35] : memref<32x32xf32, #tpu.memory_space<vmem>>, vector<4x16xf32>
    tpu.vector_store %arg9[%c12_34, %c16_35], %72 {strides = array<i32>} : memref<32x32xf32, #tpu.memory_space<vmem>>, vector<4x16xf32>,
    %74 = vector.extract_strided_slice %22 {offsets = [20, 0], sizes = [4, 32], strides = [1, 1]} : vector<32x32xf32> to vector<4x32xf32>
    %75 = vector.extract_strided_slice %22 {offsets = [8, 0], sizes = [4, 32], strides = [1, 1]} : vector<32x32xf32> to vector<4x32xf32>
    %76 = arith.select %2, %74, %75 : vector<4x32xi1>, vector<4x32xf32>
    %cst_36 = arith.constant dense<0.000000e+00> : vector<4x32xf32>
    %77 = tpu.matmul %69, %15, %cst_36 {dimension_numbers = #tpu.dot_dimension_numbers<[1], [0], [0], [1], [0, 0, 1, 1], [], []>} : vector<4x32xf32>, vector<32x32xf32>, vector<4x32xf32> -> vector<4x32xf32>
    %78 = arith.addf %77, %76 : vector<4x32xf32>
    %79 = math.tanh %78 : vector<4x32xf32>
    %80 = vector.extract_strided_slice %79 {offsets = [0, 0], sizes = [4, 16], strides = [1, 1]} : vector<4x32xf32> to vector<4x16xf32>
    %c20_37 = arith.constant 20 : index
    %c0_38 = arith.constant 0 : index
    %81 = vector.load %arg9[%c20_37, %c0_38] : memref<32x32xf32, #tpu.memory_space<vmem>>, vector<4x16xf32>
    tpu.vector_store %arg9[%c20_37, %c0_38], %80 {strides = array<i32>} : memref<32x32xf32, #tpu.memory_space<vmem>>, vector<4x16xf32>,
    %82 = vector.extract_strided_slice %79 {offsets = [0, 16], sizes = [4, 16], strides = [1, 1]} : vector<4x32xf32> to vector<4x16xf32>
    %c8_39 = arith.constant 8 : index
    %c16_40 = arith.constant 16 : index
    %83 = vector.load %arg9[%c8_39, %c16_40] : memref<32x32xf32, #tpu.memory_space<vmem>>, vector<4x16xf32>
    tpu.vector_store %arg9[%c8_39, %c16_40], %82 {strides = array<i32>} : memref<32x32xf32, #tpu.memory_space<vmem>>, vector<4x16xf32>,
    %84 = vector.extract_strided_slice %22 {offsets = [24, 0], sizes = [4, 32], strides = [1, 1]} : vector<32x32xf32> to vector<4x32xf32>
    %85 = vector.extract_strided_slice %22 {offsets = [4, 0], sizes = [4, 32], strides = [1, 1]} : vector<32x32xf32> to vector<4x32xf32>
    %86 = arith.select %2, %84, %85 : vector<4x32xi1>, vector<4x32xf32>
    %cst_41 = arith.constant dense<0.000000e+00> : vector<4x32xf32>
    %87 = tpu.matmul %79, %15, %cst_41 {dimension_numbers = #tpu.dot_dimension_numbers<[1], [0], [0], [1], [0, 0, 1, 1], [], []>} : vector<4x32xf32>, vector<32x32xf32>, vector<4x32xf32> -> vector<4x32xf32>
    %88 = arith.addf %87, %86 : vector<4x32xf32>
    %89 = math.tanh %88 : vector<4x32xf32>
    %90 = vector.extract_strided_slice %89 {offsets = [0, 0], sizes = [4, 16], strides = [1, 1]} : vector<4x32xf32> to vector<4x16xf32>
    %c24_42 = arith.constant 24 : index
    %c0_43 = arith.constant 0 : index
    %91 = vector.load %arg9[%c24_42, %c0_43] : memref<32x32xf32, #tpu.memory_space<vmem>>, vector<4x16xf32>
    tpu.vector_store %arg9[%c24_42, %c0_43], %90 {strides = array<i32>} : memref<32x32xf32, #tpu.memory_space<vmem>>, vector<4x16xf32>,
    %92 = vector.extract_strided_slice %89 {offsets = [0, 16], sizes = [4, 16], strides = [1, 1]} : vector<4x32xf32> to vector<4x16xf32>
    %c4_44 = arith.constant 4 : index
    %c16_45 = arith.constant 16 : index
    %93 = vector.load %arg9[%c4_44, %c16_45] : memref<32x32xf32, #tpu.memory_space<vmem>>, vector<4x16xf32>
    tpu.vector_store %arg9[%c4_44, %c16_45], %92 {strides = array<i32>} : memref<32x32xf32, #tpu.memory_space<vmem>>, vector<4x16xf32>,
    %94 = vector.extract_strided_slice %22 {offsets = [28, 0], sizes = [4, 32], strides = [1, 1]} : vector<32x32xf32> to vector<4x32xf32>
    %95 = vector.extract_strided_slice %22 {offsets = [0, 0], sizes = [4, 32], strides = [1, 1]} : vector<32x32xf32> to vector<4x32xf32>
    %96 = arith.select %2, %94, %95 : vector<4x32xi1>, vector<4x32xf32>
    %cst_46 = arith.constant dense<0.000000e+00> : vector<4x32xf32>
    %97 = tpu.matmul %89, %15, %cst_46 {dimension_numbers = #tpu.dot_dimension_numbers<[1], [0], [0], [1], [0, 0, 1, 1], [], []>} : vector<4x32xf32>, vector<32x32xf32>, vector<4x32xf32> -> vector<4x32xf32>
    %98 = arith.addf %97, %96 : vector<4x32xf32>
    %99 = math.tanh %98 : vector<4x32xf32>
    %100 = vector.extract_strided_slice %99 {offsets = [0, 0], sizes = [4, 16], strides = [1, 1]} : vector<4x32xf32> to vector<4x16xf32>
    %c28_47 = arith.constant 28 : index
    %c0_48 = arith.constant 0 : index
    %101 = vector.load %arg9[%c28_47, %c0_48] : memref<32x32xf32, #tpu.memory_space<vmem>>, vector<4x16xf32>
    tpu.vector_store %arg9[%c28_47, %c0_48], %100 {strides = array<i32>} : memref<32x32xf32, #tpu.memory_space<vmem>>, vector<4x16xf32>,
    %102 = vector.extract_strided_slice %99 {offsets = [0, 16], sizes = [4, 16], strides = [1, 1]} : vector<4x32xf32> to vector<4x16xf32>
    %c0_49 = arith.constant 0 : index
    %c16_50 = arith.constant 16 : index
    %103 = vector.load %arg9[%c0_49, %c16_50] : memref<32x32xf32, #tpu.memory_space<vmem>>, vector<4x16xf32>
    tpu.vector_store %arg9[%c0_49, %c16_50], %102 {strides = array<i32>} : memref<32x32xf32, #tpu.memory_space<vmem>>, vector<4x16xf32>,
    %cst_51 = arith.constant dense<0.000000e+00> : vector<4x4xf32>
    %104 = tpu.matmul %99, %19, %cst_51 {dimension_numbers = #tpu.dot_dimension_numbers<[1], [0], [0], [1], [0, 0, 1, 1], [], []>} : vector<4x32xf32>, vector<32x4xf32>, vector<4x4xf32> -> vector<4x4xf32>
    %105 = arith.addf %11, %104 : vector<4x4xf32>
    %c0_52 = arith.constant 0 : index
    %c0_53 = arith.constant 0 : index
    %106 = vector.load %arg9[%c0_52, %c0_53] : memref<32x32xf32, #tpu.memory_space<vmem>>, vector<32x32xf32>
    %c1 = arith.constant 1 : index
    %c0_54 = arith.constant 0 : index
    %c0_55 = arith.constant 0 : index
    %107 = vector.load %arg3[%c1, %c0_54, %c0_55] : memref<2x32x32xf32, #tpu.memory_space<vmem>>, vector<1x32x32xf32>
    %108 = vector.shape_cast %107 : vector<1x32x32xf32> to vector<32x32xf32>
    %c1_56 = arith.constant 1 : index
    %c0_57 = arith.constant 0 : index
    %c0_58 = arith.constant 0 : index
    %109 = vector.load %arg4[%c1_56, %c0_57, %c0_58] : memref<2x32x32xf32, #tpu.memory_space<vmem>>, vector<1x32x32xf32>
    %110 = vector.shape_cast %109 : vector<1x32x32xf32> to vector<32x32xf32>
    %c1_59 = arith.constant 1 : index
    %c0_60 = arith.constant 0 : index
    %c0_61 = arith.constant 0 : index
    %111 = vector.load %arg5[%c1_59, %c0_60, %c0_61] : memref<2x1x32xf32, #tpu.memory_space<vmem>>, vector<1x1x32xf32>
    %112 = vector.shape_cast %111 : vector<1x1x32xf32> to vector<1x32xf32>
    %c1_62 = arith.constant 1 : index
    %c0_63 = arith.constant 0 : index
    %c0_64 = arith.constant 0 : index
    %113 = vector.load %arg6[%c1_62, %c0_63, %c0_64] : memref<2x32x4xf32, #tpu.memory_space<vmem>>, vector<1x32x4xf32>
    %114 = vector.shape_cast %113 : vector<1x32x4xf32> to vector<32x4xf32>
    %cst_65 = arith.constant dense<0.000000e+00> : vector<32x32xf32>
    %115 = tpu.matmul %106, %108, %cst_65 {dimension_numbers = #tpu.dot_dimension_numbers<[1], [0], [0], [1], [0, 0, 1, 1], [], []>} : vector<32x32xf32>, vector<32x32xf32>, vector<32x32xf32> -> vector<32x32xf32>
    %116 = vector.broadcast %112 : vector<1x32xf32> to vector<32x32xf32>
    %117 = arith.addf %115, %116 : vector<32x32xf32>
    %cst_66 = arith.constant 0.000000e+00 : f32
    %118 = vector.broadcast %cst_66 : f32 to vector<4x32xf32>
    %119 = vector.extract_strided_slice %117 {offsets = [0, 0], sizes = [4, 32], strides = [1, 1]} : vector<32x32xf32> to vector<4x32xf32>
    %120 = vector.extract_strided_slice %117 {offsets = [28, 0], sizes = [4, 32], strides = [1, 1]} : vector<32x32xf32> to vector<4x32xf32>
    %121 = arith.select %2, %119, %120 : vector<4x32xi1>, vector<4x32xf32>
    %cst_67 = arith.constant dense<0.000000e+00> : vector<4x32xf32>
    %122 = tpu.matmul %118, %110, %cst_67 {dimension_numbers = #tpu.dot_dimension_numbers<[1], [0], [0], [1], [0, 0, 1, 1], [], []>} : vector<4x32xf32>, vector<32x32xf32>, vector<4x32xf32> -> vector<4x32xf32>
    %123 = arith.addf %122, %121 : vector<4x32xf32>
    %124 = math.tanh %123 : vector<4x32xf32>
    %125 = vector.extract_strided_slice %117 {offsets = [4, 0], sizes = [4, 32], strides = [1, 1]} : vector<32x32xf32> to vector<4x32xf32>
    %126 = vector.extract_strided_slice %117 {offsets = [24, 0], sizes = [4, 32], strides = [1, 1]} : vector<32x32xf32> to vector<4x32xf32>
    %127 = arith.select %2, %125, %126 : vector<4x32xi1>, vector<4x32xf32>
    %cst_68 = arith.constant dense<0.000000e+00> : vector<4x32xf32>
    %128 = tpu.matmul %124, %110, %cst_68 {dimension_numbers = #tpu.dot_dimension_numbers<[1], [0], [0], [1], [0, 0, 1, 1], [], []>} : vector<4x32xf32>, vector<32x32xf32>, vector<4x32xf32> -> vector<4x32xf32>
    %129 = arith.addf %128, %127 : vector<4x32xf32>
    %130 = math.tanh %129 : vector<4x32xf32>
    %131 = vector.extract_strided_slice %117 {offsets = [8, 0], sizes = [4, 32], strides = [1, 1]} : vector<32x32xf32> to vector<4x32xf32>
    %132 = vector.extract_strided_slice %117 {offsets = [20, 0], sizes = [4, 32], strides = [1, 1]} : vector<32x32xf32> to vector<4x32xf32>
    %133 = arith.select %2, %131, %132 : vector<4x32xi1>, vector<4x32xf32>
    %cst_69 = arith.constant dense<0.000000e+00> : vector<4x32xf32>
    %134 = tpu.matmul %130, %110, %cst_69 {dimension_numbers = #tpu.dot_dimension_numbers<[1], [0], [0], [1], [0, 0, 1, 1], [], []>} : vector<4x32xf32>, vector<32x32xf32>, vector<4x32xf32> -> vector<4x32xf32>
    %135 = arith.addf %134, %133 : vector<4x32xf32>
    %136 = math.tanh %135 : vector<4x32xf32>
    %137 = vector.extract_strided_slice %117 {offsets = [12, 0], sizes = [4, 32], strides = [1, 1]} : vector<32x32xf32> to vector<4x32xf32>
    %138 = vector.extract_strided_slice %117 {offsets = [16, 0], sizes = [4, 32], strides = [1, 1]} : vector<32x32xf32> to vector<4x32xf32>
    %139 = arith.select %2, %137, %138 : vector<4x32xi1>, vector<4x32xf32>
    %cst_70 = arith.constant dense<0.000000e+00> : vector<4x32xf32>
    %140 = tpu.matmul %136, %110, %cst_70 {dimension_numbers = #tpu.dot_dimension_numbers<[1], [0], [0], [1], [0, 0, 1, 1], [], []>} : vector<4x32xf32>, vector<32x32xf32>, vector<4x32xf32> -> vector<4x32xf32>
    %141 = arith.addf %140, %139 : vector<4x32xf32>
    %142 = math.tanh %141 : vector<4x32xf32>
    %143 = vector.extract_strided_slice %117 {offsets = [16, 0], sizes = [4, 32], strides = [1, 1]} : vector<32x32xf32> to vector<4x32xf32>
    %144 = vector.extract_strided_slice %117 {offsets = [12, 0], sizes = [4, 32], strides = [1, 1]} : vector<32x32xf32> to vector<4x32xf32>
    %145 = arith.select %2, %143, %144 : vector<4x32xi1>, vector<4x32xf32>
    %cst_71 = arith.constant dense<0.000000e+00> : vector<4x32xf32>
    %146 = tpu.matmul %142, %110, %cst_71 {dimension_numbers = #tpu.dot_dimension_numbers<[1], [0], [0], [1], [0, 0, 1, 1], [], []>} : vector<4x32xf32>, vector<32x32xf32>, vector<4x32xf32> -> vector<4x32xf32>
    %147 = arith.addf %146, %145 : vector<4x32xf32>
    %148 = math.tanh %147 : vector<4x32xf32>
    %149 = vector.extract_strided_slice %117 {offsets = [20, 0], sizes = [4, 32], strides = [1, 1]} : vector<32x32xf32> to vector<4x32xf32>
    %150 = vector.extract_strided_slice %117 {offsets = [8, 0], sizes = [4, 32], strides = [1, 1]} : vector<32x32xf32> to vector<4x32xf32>
    %151 = arith.select %2, %149, %150 : vector<4x32xi1>, vector<4x32xf32>
    %cst_72 = arith.constant dense<0.000000e+00> : vector<4x32xf32>
    %152 = tpu.matmul %148, %110, %cst_72 {dimension_numbers = #tpu.dot_dimension_numbers<[1], [0], [0], [1], [0, 0, 1, 1], [], []>} : vector<4x32xf32>, vector<32x32xf32>, vector<4x32xf32> -> vector<4x32xf32>
    %153 = arith.addf %152, %151 : vector<4x32xf32>
    %154 = math.tanh %153 : vector<4x32xf32>
    %155 = vector.extract_strided_slice %117 {offsets = [24, 0], sizes = [4, 32], strides = [1, 1]} : vector<32x32xf32> to vector<4x32xf32>
    %156 = vector.extract_strided_slice %117 {offsets = [4, 0], sizes = [4, 32], strides = [1, 1]} : vector<32x32xf32> to vector<4x32xf32>
    %157 = arith.select %2, %155, %156 : vector<4x32xi1>, vector<4x32xf32>
    %cst_73 = arith.constant dense<0.000000e+00> : vector<4x32xf32>
    %158 = tpu.matmul %154, %110, %cst_73 {dimension_numbers = #tpu.dot_dimension_numbers<[1], [0], [0], [1], [0, 0, 1, 1], [], []>} : vector<4x32xf32>, vector<32x32xf32>, vector<4x32xf32> -> vector<4x32xf32>
    %159 = arith.addf %158, %157 : vector<4x32xf32>
    %160 = math.tanh %159 : vector<4x32xf32>
    %161 = vector.extract_strided_slice %117 {offsets = [28, 0], sizes = [4, 32], strides = [1, 1]} : vector<32x32xf32> to vector<4x32xf32>
    %162 = vector.extract_strided_slice %117 {offsets = [0, 0], sizes = [4, 32], strides = [1, 1]} : vector<32x32xf32> to vector<4x32xf32>
    %163 = arith.select %2, %161, %162 : vector<4x32xi1>, vector<4x32xf32>
    %cst_74 = arith.constant dense<0.000000e+00> : vector<4x32xf32>
    %164 = tpu.matmul %160, %110, %cst_74 {dimension_numbers = #tpu.dot_dimension_numbers<[1], [0], [0], [1], [0, 0, 1, 1], [], []>} : vector<4x32xf32>, vector<32x32xf32>, vector<4x32xf32> -> vector<4x32xf32>
    %165 = arith.addf %164, %163 : vector<4x32xf32>
    %166 = math.tanh %165 : vector<4x32xf32>
    %cst_75 = arith.constant dense<0.000000e+00> : vector<4x4xf32>
    %167 = tpu.matmul %166, %114, %cst_75 {dimension_numbers = #tpu.dot_dimension_numbers<[1], [0], [0], [1], [0, 0, 1, 1], [], []>} : vector<4x32xf32>, vector<32x4xf32>, vector<4x4xf32> -> vector<4x4xf32>
    %168 = arith.addf %105, %167 : vector<4x4xf32>
    %c0_76 = arith.constant 0 : index
    %c0_77 = arith.constant 0 : index
    %169 = vector.load %arg7[%c0_76, %c0_77] : memref<1x4xf32, #tpu.memory_space<vmem>>, vector<1x4xf32>
    %170 = vector.broadcast %169 : vector<1x4xf32> to vector<4x4xf32>
    %171 = arith.addf %168, %170 : vector<4x4xf32>
    %c0_78 = arith.constant 0 : index
    %c0_79 = arith.constant 0 : index
    %172 = vector.load %arg8[%c0_78, %c0_79] : memref<4x4xf32, #tpu.memory_space<vmem>>, vector<4x4xf32>
    tpu.vector_store %arg8[%c0_78, %c0_79], %171 {strides = array<i32>} : memref<4x4xf32, #tpu.memory_space<vmem>>, vector<4x4xf32>,
    return
  }
  func.func @transform_0(%arg0: i32) -> (i32, i32) {
    %c0_i32 = arith.constant 0 : i32
    %c0_i32_0 = arith.constant 0 : i32
    %c0_i32_1 = arith.constant 0 : i32
    return %c0_i32, %c0_i32_0 : i32, i32
  }
  func.func @transform_1(%arg0: i32) -> (i32, i32) {
    %c0_i32 = arith.constant 0 : i32
    %c0_i32_0 = arith.constant 0 : i32
    %c0_i32_1 = arith.constant 0 : i32
    return %c0_i32, %c0_i32_0 : i32, i32
  }
  func.func @transform_2(%arg0: i32) -> (i32, i32, i32) {
    %c0_i32 = arith.constant 0 : i32
    %c0_i32_0 = arith.constant 0 : i32
    %c0_i32_1 = arith.constant 0 : i32
    %c0_i32_2 = arith.constant 0 : i32
    return %c0_i32, %c0_i32_0, %c0_i32_1 : i32, i32, i32
  }
  func.func @transform_3(%arg0: i32) -> (i32, i32, i32) {
    %c0_i32 = arith.constant 0 : i32
    %c0_i32_0 = arith.constant 0 : i32
    %c0_i32_1 = arith.constant 0 : i32
    %c0_i32_2 = arith.constant 0 : i32
    return %c0_i32, %c0_i32_0, %c0_i32_1 : i32, i32, i32
  }
  func.func @transform_4(%arg0: i32) -> (i32, i32, i32) {
    %c0_i32 = arith.constant 0 : i32
    %c0_i32_0 = arith.constant 0 : i32
    %c0_i32_1 = arith.constant 0 : i32
    %c0_i32_2 = arith.constant 0 : i32
    return %c0_i32, %c0_i32_0, %c0_i32_1 : i32, i32, i32
  }
  func.func @transform_5(%arg0: i32) -> (i32, i32, i32) {
    %c0_i32 = arith.constant 0 : i32
    %c0_i32_0 = arith.constant 0 : i32
    %c0_i32_1 = arith.constant 0 : i32
    %c0_i32_2 = arith.constant 0 : i32
    return %c0_i32, %c0_i32_0, %c0_i32_1 : i32, i32, i32
  }
  func.func @transform_6(%arg0: i32) -> (i32, i32) {
    %c0_i32 = arith.constant 0 : i32
    %c0_i32_0 = arith.constant 0 : i32
    %c0_i32_1 = arith.constant 0 : i32
    return %c0_i32, %c0_i32_0 : i32, i32
  }
  func.func @transform_7(%arg0: i32) -> (i32, i32) {
    %c0_i32 = arith.constant 0 : i32
    %c0_i32_0 = arith.constant 0 : i32
    %c0_i32_1 = arith.constant 0 : i32
    return %c0_i32, %c0_i32_0 : i32, i32
  }
}

</mosaic_0001>

<bundles_post_ra>
// kernel: tpu_custom_call.1
= control target key start
LH: loop header
LB: loop body
LE: loop exit
PB: predicated region body
PF: predicated region fallthrough
CT: control target
= control target key end

     0   :  { %12 = vsyncpa [#allocation4], 0  ;;  %s2815_s0 = inlined_call_operand.vmem [shape: s32[32,1], index: 0, kind: input, shape index: {}]   ;;  %s2816_s1 = inlined_call_operand.vmem [shape: f32[32,32], index: 1, kind: input, shape index: {}]   ;;  %s2817_s2 = inlined_call_operand.vmem [shape: f32[2,32,32], index: 2, kind: input, shape index: {}]   ;;  %s2818_s3 = inlined_call_operand.hbm [shape: f32[2,32,32], index: 3, kind: input, shape index: {}]   ;;  %s2819_s4 = inlined_call_operand.vmem [shape: f32[2,1,32], index: 4, kind: input, shape index: {}]   ;;  %s2820_s5 = inlined_call_operand.vmem [shape: f32[2,32,4], index: 5, kind: input, shape index: {}]   ;;  %s2821_s6 = inlined_call_operand.vmem [shape: f32[1,4], index: 6, kind: input, shape index: {}]   ;;  %s2822_s7 = inlined_call_operand.hbm [shape: f32[4,4], index: 7, kind: output, shape index: {}]  }
   0x1   :  { %13 = vsyncpa [#allocation5], 0  ;;  %s2460_s24 = smov [#allocation3]   ;;  %s2412_s28 = scalar_lea.hbm %s2818_s3, 1024 }
   0x2   :  { %s25_s25 = sshll.u32 %s2460_s24, 4  ;;  %p2413_p0 = scmp.ne.s32.totalorder %s2818_s3, %s2412_s28  ;;  %s26_s25 = int_to_ptr.vmem [resolvable:$true] %s25_s25 }
   0x3   :  { %p2416_p1 = scmp.lt.u32.totalorder %s2412_s28, %s2818_s3 }
   0x5   :  { %p2418_p2 = pnand %p2416_p1, %p2413_p0 }
   0x7   :  { %2421 = shalt.err (!%p2418_p2)
}
   0x8   :  { %s2422_s10 = scalar_lea.vmem %s26_s25, 1024  ;;  %p2427_p4 = scmp.lt.s32.totalorder %s26_s25, %s26_s25 }
   0x9   :  { %p2423_p3 = scmp.ne.s32.totalorder %s26_s25, %s2422_s10  ;;  %p2428_p5 = scmp.lt.s32.totalorder %s2422_s10, %s2422_s10 }
   0xb   :  { %p2429_p6 = por %p2428_p5, %p2427_p4 }
   0xd   :  { %p2430_p7 = pnand %p2429_p6, %p2423_p3 }
   0xf   :  { %2433 = shalt.err (!%p2430_p7)
}
  0x10   :  { %s2461_s11 = smov 128   ;;  %s2462_s12 = smov 8  }
  0x11   :  { %31 = dma.hbm_to_vmem [thread:$0]  %s2818_s3, 1024, %s26_s25, [#allocation4], %s2461_s11, %s2461_s11, %s2462_s12  }
  0x12   :  { %2456 = dma.done.wait [#allocation4], 1024  }
  0x13   :  { %2457 = vsyncadd [#allocation4], 4294966272  ;;  %v2463_v0 = vmov 0   ;;  %v46_v1 = vld [vmem:[%s2815_s0 + $0x10] sm:$0xff]  ;;  %v44_v2 = vld [vmem:[%s2815_s0] sm:$0xff]  ;;  %v41_v17 = vlaneseq  ;;  %vm76_vm0 = vcmask 261120  }
  0x14   :  { %2379 = vset.pattern.permute.xlu1 %v2463_v0  ;;  %2378 = vset.pattern.permute.xlu0 %v2463_v0  ;;  %v47_v3 = vld [vmem:[%s2815_s0 + $0x18] sm:$0xff]  ;;  %v72_v4 = vld [vmem:[%s2816_s1] sm:$0xff]  ;;  %v73_v5 = vld [vmem:[%s2816_s1 + $0x8] sm:$0xff]  ;;  %v2464_v21 = vmov 0.0   ;;  %v2465_v31 = vmov 0.0|0.0   ;;  %vm2466_vm5 = vmmov 0  }
  0x15   :  { %55 = vperm.xlu1 %2379, %v46_v1   ;;  %49 = vperm.xlu0 %2378, %v44_v2   ;;  %v45_v6 = vld [vmem:[%s2815_s0 + $0x8] sm:$0xff]  ;;  %v2238_v7 = vpack.c.bf16 %v73_v5, %v72_v4  ;;  %v74_v8 = vld [vmem:[%s2816_s1 + $0x10] sm:$0xff]  ;;  %v75_v9 = vld [vmem:[%s2816_s1 + $0x18] sm:$0xff]  ;;  %v2556_v18 = vand.u32 127, %v41_v17  ;;  %vm368_vm7 = vcmask 125952   ;;  %vm370_vm8 = vcmask 257152  }
  0x16   :  { %v2242_v10 = vpack.c.bf16 %v75_v9, %v74_v8  ;;  %v174_v11 = vld [vmem:[%s2817_s2] sm:$0xff]  ;;  %v175_v12 = vld [vmem:[%s2817_s2 + $0x8] sm:$0xff]  ;;  %v176_v13 = vld [vmem:[%s2817_s2 + $0x10] sm:$0xff]  ;;  %s2467_s15 = smov [#allocation6]   ;;  %vm1823_vm9 = vcmask 27648  }
  0x17   :  { %2239 = vmatprep.subr.bf16.mxu0 %v2238_v7  ;;  %v2246_v14 = vpack.c.bf16 %v175_v12, %v174_v11  ;;  %v177_v15 = vld [vmem:[%s2817_s2 + $0x18] sm:$0xff]  ;;  %v178_v28 = vld [vmem:[#allocation3] sm:$0xff]  ;;  %v179_v29 = vld [vmem:[#allocation3 + $0x8] sm:$0xff]  ;;  %vm43_vm6 = vcmp.lt.s32.totalorder %v2556_v18, 16 }
  0x18   :  { %2241 = vmatpush3.bf16.msra.mxu0 %v2238_v7  ;;  %v2250_v16 = vpack.c.bf16 %v177_v15, %v176_v13  ;;  %v2570_v30 = vpack.c.bf16 %v179_v29, %v178_v28  ;;  %v180_v32 = vld [vmem:[#allocation3 + $0x10] sm:$0xff]  ;;  %v181_v33 = vld [vmem:[#allocation3 + $0x18] sm:$0xff]  ;;  %v1862_v28 = vld [vmem:[%s2817_s2 + $0x30] sm:$0xff] }
  0x19   :  { %58 = vperm.xlu1 %2379, %v47_v3   ;;  %52 = vperm.xlu0 %2378, %v45_v6   ;;  %v2576_v34 = vpack.c.bf16 %v181_v33, %v180_v32  ;;  %v1848_v41 = vld [vmem:[%s2819_s4] ss:$0 sm:$0xff]  ;;  %v1863_v29 = vld [vmem:[%s2817_s2 + $0x38] sm:$0xff]  ;;  %v938_v32 = vld [vmem:[#allocation3 + $0x20] sm:$0xff] }
  0x1a   :  { %2243 = vmatprep.subr.bf16.mxu0 %v2242_v10  ;;  %2247 = vmatprep.subr.bf16.mxu1 %v2246_v14  ;;  %v939_v33 = vld [vmem:[#allocation3 + $0x28] sm:$0xff] }
  0x1b   :  { %2249 = vmatpush3.bf16.msra.mxu1 %v2246_v14 }
  0x1c   :  { %2245 = vmatpush3.bf16.msra.mxu0 %v2242_v10  ;;  %2251 = vmatprep.subr.bf16.mxu1 %v2250_v16 }
  0x1d   :  { %2254 = vmatprep.subr.bf16.mxu0 %v2465_v31 }
  0x1f   :  { %2253 = vmatpush3.bf16.msra.mxu1 %v2250_v16 }
  0x20   :  { %2260 = vmatprep.subr.bf16.mxu1 %v2465_v31 }
  0x94   :  { %v56_v19 = vpop.permute.xlu1 %55  ;;  %v50_v20 = vpop.permute.xlu0 %49 }
  0x95   :  { %vm60_vm1 = vcmp.eq.s32.totalorder %v50_v20, %v2556_v18  ;;  %vm62_vm2 = vcmp.eq.s32.totalorder %v56_v19, %v2556_v18 }
  0x96   :  { %v1840_v22 = vsel %vm60_vm1, 1.0, %v2464_v21  ;;  %v1842_v25 = vsel %vm62_vm2, 1.0, %v2464_v21 }
  0x97   :  { %2006 = vmatprep.mubr.msk.f32.mxu0 %vm76_vm0, %v1840_v22 }
  0x98   :  { %v59_v23 = vpop.permute.xlu1 %58  ;;  %v53_v24 = vpop.permute.xlu0 %52 }
  0x99   :  { %vm61_vm3 = vcmp.eq.s32.totalorder %v53_v24, %v2556_v18  ;;  %vm63_vm4 = vcmp.eq.s32.totalorder %v59_v23, %v2556_v18 }
  0x9a   :  { %v1841_v26 = vsel %vm61_vm3, 1.0, %v2464_v21  ;;  %v1843_v27 = vsel %vm63_vm4, 1.0, %v2464_v21 }
  0x9b   :  { %2007 = vmatmul.mubr.msk.f32.vlgmr.msra.gmra.mrb[0].mxu0 %vm76_vm0, %v1841_v26  ;;  %v1861_v26 = vld [vmem:[%s2817_s2 + $0x28] sm:$0xff] }
  0x9c   :  { %2009 = vmatprep.mubr.msk.f32.mxu0 %vm76_vm0, %v1842_v25  ;;  %2256 = vmatpush3.bf16.msra.mxu0 %v2570_v30  ;;  %v1860_v25 = vld [vmem:[%s2817_s2 + $0x20] sm:$0xff] }
  0x9d   :  { %2257 = vmatprep.subr.bf16.mxu0 %v2465_v31 }
  0x9f   :  { %2010 = vmatmul.mubr.msk.f32.gmra.mrb[2].mxu0 %vm76_vm0, %v1843_v27  ;;  %v2302_v27 = vpack.c.bf16 %v1861_v26, %v1860_v25 }
  0xa0   :  { %2259 = vmatpush3.bf16.msra.mxu0 %v2576_v34  ;;  %2034 = vmatprep.mubr.msk.f32.mxu0 %vm2466_vm5, %v2464_v21 }
  0xa1   :  { %2266 = vmatprep.subr.bf16.mxu0 %v2465_v31 }
  0xa3   :  { %2035 = vmatmul.mubr.f32.vlgmr.msra.gmra.mrb[4].mxu0 %v2464_v21 }
  0xa4   :  { %2268 = vmatpush3.bf16.msra.mxu0 %v2570_v30  ;;  %2056 = vmatprep.mubr.msk.f32.mxu0 %vm2466_vm5, %v2464_v21 }
  0xa5   :  { %2269 = vmatprep.subr.bf16.mxu0 %v2465_v31 }
  0xa8   :  { %2271 = vmatpush3.bf16.msra.mxu0 %v2576_v34 }
  0xa9   :  { %2278 = vmatprep.subr.bf16.mxu0 %v2465_v31 }
 0x16e   :  { %v2008_v35 = vpop.f32.mrb[0].mxu0 }
 0x16f   :  { %v155_v36 = vpop.f32.mrb[1].mxu0 }
 0x170   :  { %2020 = vmatprep.mubr.msk.f32.mxu1 %vm76_vm0, %v155_v36  ;;  %v941_v36 = vld [vmem:[#allocation3 + $0x38] sm:$0xff] }
 0x171   :  { %2021 = vmatmul.mubr.msk.f32.vlgmr.msra.gmra.mrb[0].mxu1 %vm76_vm0, %v2008_v35  ;;  %v940_v35 = vld [vmem:[#allocation3 + $0x30] sm:$0xff] }
 0x172   :  { %v2011_v37 = vpop.f32.mrb[2].mxu0  ;;  %2262 = vmatpush3.bf16.msra.mxu1 %v2570_v30 }
 0x173   :  { %v165_v38 = vpop.f32.mrb[3].mxu0  ;;  %2263 = vmatprep.subr.bf16.mxu1 %v2465_v31 }
 0x174   :  { %2023 = vmatprep.mubr.msk.f32.mxu1 %vm76_vm0, %v165_v38 }
 0x175   :  { %2024 = vmatmul.mubr.msk.f32.gmra.mrb[2].mxu1 %vm76_vm0, %v2011_v37  ;;  %v2687_v37 = vpack.c.bf16 %v941_v36, %v940_v35  ;;  %v185_v35 = vld [vmem:[%s2820_s5 + $0x10] sm:$0xff]  ;;  %v186_v36 = vld [vmem:[%s2820_s5 + $0x18] sm:$0xff] }
 0x176   :  { %2265 = vmatpush3.bf16.msra.mxu1 %v2576_v34  ;;  %2045 = vmatprep.mubr.msk.f32.mxu1 %vm2466_vm5, %v2464_v21  ;;  %v363_v39 = vpop.f32.mrb[4].mxu0 }
 0x177   :  { %2272 = vmatprep.subr.bf16.mxu1 %v2465_v31  ;;  %v2036_v40 = vpop.f32.mrb[5].mxu0 }
 0x244   :  { %v2022_v42 = vpop.f32.mrb[0].mxu1 }
 0x245   :  { %v277_v43 = vadd.f32 %v2022_v42, %v1848_v41  ;;  %v271_v44 = vpop.f32.mrb[1].mxu1 }
 0x246   :  { %v272_v45 = vadd.f32 %v1848_v41, %v271_v44 }
 0x247   :  { %v611_v50 = vrot.slane %v277_v43, 4 }
 0x248   :  { %v770_v46 = vrot.slane %v272_v45, 4  ;;  %v2025_v47 = vpop.f32.mrb[2].mxu1 }
 0x249   :  { %v287_v48 = vadd.f32 %v2025_v47, %v1848_v41  ;;  %v281_v49 = vpop.f32.mrb[3].mxu1 }
 0x24a   :  { %v282_v51 = vadd.f32 %v1848_v41, %v281_v49  ;;  %v1869_v49 = vld [vmem:[%s2819_s4 + $0x1] ss:$0 sm:$0xff] }
 0x24b   :  { %v291_v52 = vrot.slane %v287_v48, 4  ;;  %v2605_v53 = vsel %vm43_vm6, %v287_v48, %v770_v46 }
 0x24c   :  { %v452_v54 = vrot.slane %v282_v51, 4  ;;  %v2609_v55 = vsel %vm43_vm6, %v282_v51, %v611_v50  ;;  %v850_v38 = vrot.slane %v2605_v53, 4 }
 0x24d   :  { %v293_v56 = vsel %vm43_vm6, %v272_v45, %v291_v52  ;;  %v691_v14 = vrot.slane %v2609_v55, 4 }
 0x24e   :  { %v364_v57 = vadd.f32 %v363_v39, %v293_v56  ;;  %v454_v58 = vsel %vm43_vm6, %v277_v43, %v452_v54  ;;  %v373_v60 = vrot.slane %v293_v56, 4 }
 0x24f   :  { %v532_v5 = vrot.slane %v454_v58, 4 }
 0x250   :  { %2380 = vtanh.f32 %v364_v57 }
 0x25a   :  { %v2381_v59 = vpop.eup %2380 }
 0x25b   :  { %369 = vst.msk [vmem:[#allocation2] sm:$0xf] %vm368_vm7, %v2381_v59  ;;  %2046 = vmatmul.mubr.msk.f32.vlgmr.msra.gmra.mrb[4].mxu1 %vm76_vm0, %v2381_v59 }
 0x25c   :  { %371 = vst.msk [vmem:[#allocation2 + $0x1c] sm:$0xf] %vm370_vm8, %v2381_v59  ;;  %2274 = vmatpush3.bf16.msra.mxu1 %v2570_v30  ;;  %2067 = vmatprep.mubr.msk.f32.mxu1 %vm2466_vm5, %v2464_v21 }
 0x25d   :  { %2275 = vmatprep.subr.bf16.mxu1 %v2465_v31 }
 0x260   :  { %2277 = vmatpush3.bf16.msra.mxu1 %v2576_v34 }
 0x261   :  { %2284 = vmatprep.subr.bf16.mxu1 %v2465_v31 }
 0x32e   :  { %v444_v61 = vpop.f32.mrb[4].mxu1 }
 0x32f   :  { %v445_v62 = vadd.f32 %v444_v61, %v373_v60  ;;  %v2047_v63 = vpop.f32.mrb[5].mxu1 }
 0x331   :  { %2382 = vtanh.f32 %v445_v62 }
 0x33b   :  { %v2383_v0 = vpop.eup %2382 }
 0x33c   :  { %449 = vst.msk [vmem:[#allocation2 + $0x4] sm:$0xf] %vm368_vm7, %v2383_v0  ;;  %2057 = vmatmul.mubr.msk.f32.vlgmr.msra.gmra.mrb[6].mxu0 %vm76_vm0, %v2383_v0 }
 0x33d   :  { %450 = vst.msk [vmem:[#allocation2 + $0x18] sm:$0xf] %vm370_vm8, %v2383_v0  ;;  %2280 = vmatpush3.bf16.msra.mxu0 %v2570_v30  ;;  %2078 = vmatprep.mubr.msk.f32.mxu0 %vm2466_vm5, %v2464_v21 }
 0x33e   :  { %2281 = vmatprep.subr.bf16.mxu0 %v2465_v31 }
 0x341   :  { %2283 = vmatpush3.bf16.msra.mxu0 %v2576_v34 }
 0x342   :  { %2290 = vmatprep.subr.bf16.mxu0 %v2465_v31 }
 0x40f   :  { %v524_v1 = vpop.f32.mrb[6].mxu0 }
 0x410   :  { %v525_v2 = vadd.f32 %v524_v1, %v454_v58  ;;  %v2058_v3 = vpop.f32.mrb[7].mxu0 }
 0x412   :  { %2384 = vtanh.f32 %v525_v2 }
 0x41c   :  { %v2385_v4 = vpop.eup %2384 }
 0x41d   :  { %529 = vst.msk [vmem:[#allocation2 + $0x8] sm:$0xf] %vm368_vm7, %v2385_v4  ;;  %2068 = vmatmul.mubr.msk.f32.vlgmr.msra.gmra.mrb[6].mxu1 %vm76_vm0, %v2385_v4 }
 0x41e   :  { %530 = vst.msk [vmem:[#allocation2 + $0x14] sm:$0xf] %vm370_vm8, %v2385_v4  ;;  %2286 = vmatpush3.bf16.msra.mxu1 %v2570_v30  ;;  %2089 = vmatprep.mubr.msk.f32.mxu1 %vm2466_vm5, %v2464_v21 }
 0x41f   :  { %2287 = vmatprep.subr.bf16.mxu1 %v2465_v31 }
 0x422   :  { %2289 = vmatpush3.bf16.msra.mxu1 %v2576_v34 }
 0x423   :  { %2296 = vmatprep.subr.bf16.mxu1 %v2465_v31 }
 0x4f0   :  { %v603_v6 = vpop.f32.mrb[6].mxu1 }
 0x4f1   :  { %v604_v7 = vadd.f32 %v603_v6, %v532_v5  ;;  %v2069_v8 = vpop.f32.mrb[7].mxu1 }
 0x4f3   :  { %2386 = vtanh.f32 %v604_v7 }
 0x4fd   :  { %v2387_v9 = vpop.eup %2386 }
 0x4fe   :  { %608 = vst.msk [vmem:[#allocation2 + $0xc] sm:$0xf] %vm368_vm7, %v2387_v9  ;;  %2079 = vmatmul.mubr.msk.f32.vlgmr.msra.gmra.mrb[8].mxu0 %vm76_vm0, %v2387_v9 }
 0x4ff   :  { %609 = vst.msk [vmem:[#allocation2 + $0x10] sm:$0xf] %vm370_vm8, %v2387_v9  ;;  %2292 = vmatpush3.bf16.msra.mxu0 %v2570_v30  ;;  %2100 = vmatprep.mubr.msk.f32.mxu0 %vm2466_vm5, %v2464_v21 }
 0x500   :  { %2293 = vmatprep.subr.bf16.mxu0 %v2465_v31 }
 0x503   :  { %2295 = vmatpush3.bf16.msra.mxu0 %v2576_v34 }
 0x504   :  { %2303 = vmatprep.subr.bf16.mxu0 %v2302_v27 }
 0x5d1   :  { %v683_v10 = vpop.f32.mrb[8].mxu0 }
 0x5d2   :  { %v684_v11 = vadd.f32 %v683_v10, %v2609_v55  ;;  %v2080_v12 = vpop.f32.mrb[9].mxu0 }
 0x5d4   :  { %2388 = vtanh.f32 %v684_v11 }
 0x5de   :  { %v2389_v13 = vpop.eup %2388 }
 0x5df   :  { %688 = vst.msk [vmem:[#allocation2 + $0x10] sm:$0xf] %vm368_vm7, %v2389_v13  ;;  %2090 = vmatmul.mubr.msk.f32.vlgmr.msra.gmra.mrb[8].mxu1 %vm76_vm0, %v2389_v13 }
 0x5e0   :  { %689 = vst.msk [vmem:[#allocation2 + $0xc] sm:$0xf] %vm370_vm8, %v2389_v13  ;;  %2298 = vmatpush3.bf16.msra.mxu1 %v2570_v30  ;;  %2111 = vmatprep.mubr.msk.f32.mxu1 %vm2466_vm5, %v2464_v21  ;;  %v2306_v30 = vpack.c.bf16 %v1863_v29, %v1862_v28 }
 0x5e1   :  { %2299 = vmatprep.subr.bf16.mxu1 %v2465_v31 }
 0x5e4   :  { %2301 = vmatpush3.bf16.msra.mxu1 %v2576_v34  ;;  %v2683_v34 = vpack.c.bf16 %v939_v33, %v938_v32  ;;  %v183_v32 = vld [vmem:[%s2820_s5] sm:$0xff]  ;;  %v184_v33 = vld [vmem:[%s2820_s5 + $0x8] sm:$0xff] }
 0x5e5   :  { %2310 = vmatprep.subr.bf16.mxu1 %v2465_v31 }
 0x6b2   :  { %v762_v15 = vpop.f32.mrb[8].mxu1 }
 0x6b3   :  { %v763_v16 = vadd.f32 %v762_v15, %v691_v14  ;;  %v2091_v17 = vpop.f32.mrb[9].mxu1 }
 0x6b5   :  { %2390 = vtanh.f32 %v763_v16 }
 0x6bf   :  { %v2391_v19 = vpop.eup %2390 }
 0x6c0   :  { %767 = vst.msk [vmem:[#allocation2 + $0x14] sm:$0xf] %vm368_vm7, %v2391_v19  ;;  %2101 = vmatmul.mubr.msk.f32.vlgmr.msra.gmra.mrb[10].mxu0 %vm76_vm0, %v2391_v19 }
 0x6c1   :  { %768 = vst.msk [vmem:[#allocation2 + $0x8] sm:$0xf] %vm370_vm8, %v2391_v19  ;;  %2305 = vmatpush3.bf16.msra.mxu0 %v2302_v27 }
 0x6c2   :  { %2307 = vmatprep.subr.bf16.mxu0 %v2306_v30 }
 0x6c5   :  { %2309 = vmatpush3.bf16.msra.mxu0 %v2306_v30 }
 0x6c6   :  { %2316 = vmatprep.subr.bf16.mxu0 %v2465_v31 }
 0x6c7   :  { %v930_v45 = vld [vmem:[#allocation2 + $0x10] sm:$0xff] }
 0x6c8   :  { %v929_v44 = vld [vmem:[#allocation2 + $0x8] sm:$0xff] }
 0x793   :  { %v842_v20 = vpop.f32.mrb[10].mxu0 }
 0x794   :  { %v843_v22 = vadd.f32 %v842_v20, %v2605_v53  ;;  %v2102_v23 = vpop.f32.mrb[11].mxu0 }
 0x796   :  { %2392 = vtanh.f32 %v843_v22 }
 0x7a0   :  { %v2393_v24 = vpop.eup %2392 }
 0x7a1   :  { %847 = vst.msk [vmem:[#allocation2 + $0x18] sm:$0xf] %vm368_vm7, %v2393_v24  ;;  %2112 = vmatmul.mubr.msk.f32.vlgmr.msra.gmra.mrb[10].mxu1 %vm76_vm0, %v2393_v24 }
 0x7a2   :  { %848 = vst.msk [vmem:[#allocation2 + $0x4] sm:$0xf] %vm370_vm8, %v2393_v24  ;;  %2136 = vmatprep.mubr.msk.f32.mxu1 %vm2466_vm5, %v2464_v21  ;;  %2312 = vmatpush3.bf16.msra.mxu1 %v2683_v34 }
 0x7a3   :  { %2313 = vmatprep.subr.bf16.mxu1 %v2465_v31 }
 0x7a6   :  { %2315 = vmatpush3.bf16.msra.mxu1 %v2687_v37 }
 0x7a7   :  { %2322 = vmatprep.subr.bf16.mxu1 %v2465_v31 }
 0x7a9   :  { %2137 = vmatmul.mubr.f32.vlgmr.msra.gmra.mrb[12].mxu1 %v2464_v21 }
 0x7aa   :  { %2324 = vmatpush3.bf16.msra.mxu1 %v2683_v34  ;;  %2158 = vmatprep.mubr.msk.f32.mxu1 %vm2466_vm5, %v2464_v21 }
 0x7ab   :  { %2325 = vmatprep.subr.bf16.mxu1 %v2465_v31 }
 0x7ae   :  { %2327 = vmatpush3.bf16.msra.mxu1 %v2687_v37 }
 0x7af   :  { %2334 = vmatprep.subr.bf16.mxu1 %v2465_v31 }
 0x874   :  { %v921_v39 = vpop.f32.mrb[10].mxu1 }
 0x875   :  { %v922_v40 = vadd.f32 %v921_v39, %v850_v38  ;;  %v2113_v41 = vpop.f32.mrb[11].mxu1  ;;  %v2368_v38 = vpack.c.bf16 %v186_v36, %v185_v35  ;;  %v1865_v39 = vld [vmem:[%s2820_s5 + $0x20] sm:$0xff] }
 0x877   :  { %2394 = vtanh.f32 %v922_v40  ;;  %v1866_v40 = vld [vmem:[%s2820_s5 + $0x28] sm:$0xff] }
 0x878   :  { %v2359_v41 = vpack.c.bf16 %v1866_v40, %v1865_v39 }
 0x87c   :  { %v1122_v47 = vpop.f32.mrb[12].mxu1 }
 0x87d   :  { %v2138_v48 = vpop.f32.mrb[13].mxu1 }
 0x881   :  { %v2699_v42 = vpop.eup %2394 }
 0x882   :  { %926 = vst.msk [vmem:[#allocation2 + $0x1c] sm:$0xf] %vm368_vm7, %v2699_v42 }
 0x883   :  { %927 = vst.msk [vmem:[#allocation2] sm:$0xf] %vm370_vm8, %v2699_v42 }
 0x889   :  { %v931_v46 = vld [vmem:[#allocation2 + $0x18] sm:$0xff] }
 0x88a   :  { %v928_v43 = vld [vmem:[#allocation2] sm:$0xff] }
 0x88b   :  { %2122 = vmatprep.mubr.msk.f32.mxu0 %vm76_vm0, %v928_v43 }
 0x88c   :  { %2123 = vmatmul.mubr.msk.f32.vlgmr.msra.gmra.mrb[12].mxu0 %vm76_vm0, %v929_v44 }
 0x88d   :  { %2125 = vmatprep.mubr.msk.f32.mxu0 %vm76_vm0, %v930_v45  ;;  %2318 = vmatpush3.bf16.msra.mxu0 %v2683_v34 }
 0x88e   :  { %2319 = vmatprep.subr.bf16.mxu0 %v2465_v31 }
 0x890   :  { %2126 = vmatmul.mubr.msk.f32.gmra.mrb[14].mxu0 %vm76_vm0, %v931_v46 }
 0x891   :  { %2321 = vmatpush3.bf16.msra.mxu0 %v2687_v37  ;;  %2147 = vmatprep.mubr.msk.f32.mxu0 %vm2466_vm5, %v2464_v21 }
 0x892   :  { %2328 = vmatprep.subr.bf16.mxu0 %v2465_v31 }
 0x95f   :  { %v2124_v50 = vpop.f32.mrb[12].mxu0 }
 0x960   :  { %v1039_v51 = vadd.f32 %v2124_v50, %v1869_v49  ;;  %v1033_v52 = vpop.f32.mrb[13].mxu0 }
 0x961   :  { %v1034_v53 = vadd.f32 %v1869_v49, %v1033_v52 }
 0x962   :  { %v1360_v58 = vrot.slane %v1039_v51, 4 }
 0x963   :  { %v1515_v54 = vrot.slane %v1034_v53, 4  ;;  %v2127_v55 = vpop.f32.mrb[14].mxu0 }
 0x964   :  { %v1049_v56 = vadd.f32 %v2127_v55, %v1869_v49  ;;  %v1043_v57 = vpop.f32.mrb[15].mxu0 }
 0x965   :  { %v1044_v59 = vadd.f32 %v1869_v49, %v1043_v57 }
 0x966   :  { %v1053_v60 = vrot.slane %v1049_v56, 4  ;;  %v2720_v61 = vsel %vm43_vm6, %v1049_v56, %v1515_v54 }
 0x967   :  { %v1205_v62 = vrot.slane %v1044_v59, 4  ;;  %v1362_v63 = vsel %vm43_vm6, %v1044_v59, %v1360_v58  ;;  %v1593_v44 = vrot.slane %v2720_v61, 4 }
 0x968   :  { %v1055_v0 = vsel %vm43_vm6, %v1034_v53, %v1053_v60  ;;  %v1438_v23 = vrot.slane %v1362_v63, 4 }
 0x969   :  { %v1123_v1 = vadd.f32 %v1122_v47, %v1055_v0  ;;  %v1207_v2 = vsel %vm43_vm6, %v1039_v51, %v1205_v62  ;;  %v1128_v4 = vrot.slane %v1055_v0, 4  ;;  %v1883_v51 = vld [vmem:[%s2821_s6] ss:$0 sm:$0xff] }
 0x96a   :  { %v1283_v12 = vrot.slane %v1207_v2, 4 }
 0x96b   :  { %2396 = vtanh.f32 %v1123_v1 }
 0x975   :  { %v2397_v3 = vpop.eup %2396 }
 0x976   :  { %2148 = vmatmul.mubr.msk.f32.vlgmr.msra.gmra.mrb[16].mxu0 %vm76_vm0, %v2397_v3 }
 0x977   :  { %2330 = vmatpush3.bf16.msra.mxu0 %v2683_v34  ;;  %2169 = vmatprep.mubr.msk.f32.mxu0 %vm2466_vm5, %v2464_v21 }
 0x978   :  { %2331 = vmatprep.subr.bf16.mxu0 %v2465_v31 }
 0x97b   :  { %2333 = vmatpush3.bf16.msra.mxu0 %v2687_v37 }
 0x97c   :  { %2340 = vmatprep.subr.bf16.mxu0 %v2465_v31 }
 0xa49   :  { %v1199_v5 = vpop.f32.mrb[16].mxu0 }
 0xa4a   :  { %v1200_v6 = vadd.f32 %v1199_v5, %v1128_v4  ;;  %v2149_v18 = vpop.f32.mrb[17].mxu0 }
 0xa4c   :  { %2398 = vtanh.f32 %v1200_v6 }
 0xa56   :  { %v2399_v7 = vpop.eup %2398 }
 0xa57   :  { %2159 = vmatmul.mubr.msk.f32.vlgmr.msra.gmra.mrb[14].mxu1 %vm76_vm0, %v2399_v7 }
 0xa58   :  { %2336 = vmatpush3.bf16.msra.mxu1 %v2683_v34  ;;  %2180 = vmatprep.mubr.msk.f32.mxu1 %vm2466_vm5, %v2464_v21 }
 0xa59   :  { %2337 = vmatprep.subr.bf16.mxu1 %v2465_v31 }
 0xa5c   :  { %2339 = vmatpush3.bf16.msra.mxu1 %v2687_v37 }
 0xa5d   :  { %2346 = vmatprep.subr.bf16.mxu1 %v2465_v31 }
 0xb2a   :  { %v1277_v8 = vpop.f32.mrb[14].mxu1 }
 0xb2b   :  { %v1278_v9 = vadd.f32 %v1277_v8, %v1207_v2  ;;  %v2160_v10 = vpop.f32.mrb[15].mxu1 }
 0xb2d   :  { %2400 = vtanh.f32 %v1278_v9 }
 0xb37   :  { %v2401_v11 = vpop.eup %2400 }
 0xb38   :  { %2170 = vmatmul.mubr.msk.f32.vlgmr.msra.gmra.mrb[18].mxu0 %vm76_vm0, %v2401_v11 }
 0xb39   :  { %2342 = vmatpush3.bf16.msra.mxu0 %v2683_v34  ;;  %2191 = vmatprep.mubr.msk.f32.mxu0 %vm2466_vm5, %v2464_v21 }
 0xb3a   :  { %2343 = vmatprep.subr.bf16.mxu0 %v2465_v31 }
 0xb3d   :  { %2345 = vmatpush3.bf16.msra.mxu0 %v2687_v37 }
 0xb3e   :  { %2352 = vmatprep.subr.bf16.mxu0 %v2465_v31 }
 0xc0b   :  { %v1354_v13 = vpop.f32.mrb[18].mxu0 }
 0xc0c   :  { %v1355_v14 = vadd.f32 %v1354_v13, %v1283_v12  ;;  %v2171_v15 = vpop.f32.mrb[19].mxu0 }
 0xc0e   :  { %2402 = vtanh.f32 %v1355_v14 }
 0xc18   :  { %v2403_v16 = vpop.eup %2402 }
 0xc19   :  { %2181 = vmatmul.mubr.msk.f32.vlgmr.msra.gmra.mrb[16].mxu1 %vm76_vm0, %v2403_v16 }
 0xc1a   :  { %2348 = vmatpush3.bf16.msra.mxu1 %v2683_v34  ;;  %2202 = vmatprep.mubr.msk.f32.mxu1 %vm2466_vm5, %v2464_v21 }
 0xc1b   :  { %2349 = vmatprep.subr.bf16.mxu1 %v2465_v31 }
 0xc1e   :  { %2351 = vmatpush3.bf16.msra.mxu1 %v2687_v37 }
 0xc1f   :  { %2358 = vmatprep.subr.bf16.mxu1 %v2465_v31 }
 0xcec   :  { %v1432_v17 = vpop.f32.mrb[16].mxu1 }
 0xced   :  { %v1433_v19 = vadd.f32 %v1432_v17, %v1362_v63  ;;  %v2182_v20 = vpop.f32.mrb[17].mxu1 }
 0xcef   :  { %2404 = vtanh.f32 %v1433_v19 }
 0xcf9   :  { %v2405_v22 = vpop.eup %2404 }
 0xcfa   :  { %2192 = vmatmul.mubr.msk.f32.vlgmr.msra.gmra.mrb[20].mxu0 %vm76_vm0, %v2405_v22 }
 0xcfb   :  { %2354 = vmatpush3.bf16.msra.mxu0 %v2683_v34  ;;  %2213 = vmatprep.mubr.msk.f32.mxu0 %vm2466_vm5, %v2464_v21  ;;  %v2365_v34 = vpack.c.bf16 %v184_v33, %v183_v32 }
 0xcfc   :  { %2355 = vmatprep.subr.bf16.mxu0 %v2465_v31 }
 0xcff   :  { %2357 = vmatpush3.bf16.msra.mxu0 %v2687_v37 }
 0xd00   :  { %2364 = vmatprep.subr.bf16.mxu0 %v2465_v31 }
 0xdcd   :  { %v1509_v24 = vpop.f32.mrb[20].mxu0 }
 0xdce   :  { %v1510_v25 = vadd.f32 %v1509_v24, %v1438_v23  ;;  %v2193_v26 = vpop.f32.mrb[21].mxu0 }
 0xdd0   :  { %2406 = vtanh.f32 %v1510_v25 }
 0xdda   :  { %v2407_v27 = vpop.eup %2406 }
 0xddb   :  { %2203 = vmatmul.mubr.msk.f32.vlgmr.msra.gmra.mrb[18].mxu1 %vm76_vm0, %v2407_v27 }
 0xddc   :  { %2224 = vmatprep.mubr.msk.f32.mxu1 %vm2466_vm5, %v2464_v21  ;;  %2360 = vmatpush3.bf16.msra.mxu1 %v2359_v41 }
 0xddd   :  { %2361 = vmatprep.subr.bf16.mxu1 %v2465_v31 }
 0xeae   :  { %v1587_v28 = vpop.f32.mrb[18].mxu1 }
 0xeaf   :  { %v1588_v29 = vadd.f32 %v1587_v28, %v2720_v61  ;;  %v2204_v30 = vpop.f32.mrb[19].mxu1 }
 0xeb1   :  { %2408 = vtanh.f32 %v1588_v29 }
 0xebb   :  { %v2409_v37 = vpop.eup %2408 }
 0xebc   :  { %2214 = vmatmul.mubr.msk.f32.vlgmr.msra.gmra.mrb[22].mxu0 %vm76_vm0, %v2409_v37 }
 0xebd   :  { %2366 = vmatpush3.bf16.msra.mxu0 %v2365_v34  ;;  %2235 = vmatprep.mubr.msk.f32.mxu0 %vm2466_vm5, %v2464_v21  ;;  %v1867_v21 = vld [vmem:[%s2820_s5 + $0x30] sm:$0xff] }
 0xebe   :  { %2367 = vmatprep.subr.bf16.mxu0 %v2465_v31 }
 0xec1   :  { %2369 = vmatpush3.bf16.msra.mxu0 %v2368_v38 }
 0xec4   :  { %2236 = vmatmul.mubr.msk.f32.vlgmr.msra.gmra.mrb[24].mxu0 %vm76_vm0, %v2699_v42  ;;  %v1868_v42 = vld [vmem:[%s2820_s5 + $0x38] sm:$0xff]  ;;  %s1831_s5 = sshll.u32 %s2467_s15, 4  ;;  %s1832_s5 = int_to_ptr.vmem [resolvable:$true] %s1831_s5 }
 0xec5   :  { %v2362_v43 = vpack.c.bf16 %v1868_v42, %v1867_v21  ;;  %s2434_s16 = scalar_lea.vmem %s1832_s5, 64  ;;  %p2439_p9 = scmp.lt.s32.totalorder %s1832_s5, %s1832_s5 }
 0xec6   :  { %p2435_p8 = scmp.ne.s32.totalorder %s1832_s5, %s2434_s16  ;;  %p2440_p10 = scmp.lt.s32.totalorder %s2434_s16, %s2434_s16 }
 0xec7   :  { %2363 = vmatpush3.bf16.msra.mxu1 %v2362_v43 }
 0xec8   :  { %p2441_p11 = por %p2440_p10, %p2439_p9 }
 0xeca   :  { %p2442_p12 = pnand %p2441_p11, %p2435_p8 }
 0xf8f   :  { %v1664_v45 = vpop.f32.mrb[22].mxu0 }
 0xf90   :  { %v1665_v46 = vadd.f32 %v1664_v45, %v1593_v44  ;;  %v2215_v47 = vpop.f32.mrb[23].mxu0 }
 0xf92   :  { %2410 = vtanh.f32 %v1665_v46 }
 0xf97   :  { %v1811_v48 = vpop.f32.mrb[24].mxu0 }
 0xf98   :  { %v2237_v49 = vpop.f32.mrb[25].mxu0 }
 0xf9c   :  { %v2411_v50 = vpop.eup %2410 }
 0xf9d   :  { %2225 = vmatmul.mubr.msk.f32.vlgmr.msra.gmra.mrb[20].mxu1 %vm76_vm0, %v2411_v50 }
0x1070   :  { %v1738_v31 = vpop.f32.mrb[20].mxu1 }
0x1071   :  { %v1812_v52 = vadd.f32 %v1811_v48, %v1738_v31  ;;  %v2226_v53 = vpop.f32.mrb[21].mxu1 }
0x1073   :  { %v1822_v54 = vadd.f32 %v1883_v51, %v1812_v52 }
0x1075   :  { %1824 = vst.msk [vmem:[#allocation6] sm:$0xf] %vm1823_vm9, %v1822_v54 }
0x1076   :  { %2445 = shalt.err (!%p2442_p12)
}
0x1077   :  { %s2446_s19 = scalar_lea.hbm %s2822_s7, 64 }
0x1078   :  { %p2447_p13 = scmp.ne.s32.totalorder %s2822_s7, %s2446_s19  ;;  %p2450_p0 = scmp.lt.u32.totalorder %s2446_s19, %s2822_s7 }
0x107a   :  { %p2452_p1 = pnand %p2450_p0, %p2447_p13 }
0x107c   :  { %2455 = shalt.err (!%p2452_p1)
}
0x107d   :  { %1834 = dma.vmem_to_hbm [thread:$0]  %s1832_s5, 64, %s2822_s7, [#allocation5]  }
0x107e   :  { %2458 = dma.done.wait [#allocation5], 64  }
0x107f   :  { %2459 = vsyncadd [#allocation5], 4294967232 }
0x1080   :  { %1838 = vsyncpa [#allocation4], 1 }
0x1081   :  { %1839 = vsyncpa [#allocation5], 1 }

</bundles_post_ra>
